<compile_context>
chip_gen: v6e
topology: v6e:2x2x1
jax: 0.10.0
libtpu: 0.0.40
codegen_flags: <defaults>
</compile_context>

<pallas_src>
import functools

import jax
import jax.numpy as jnp
from jax.experimental import pallas as pl
from jax.experimental.pallas import tpu as pltpu

_LANES = 128
_VMEM_DATA_BUDGET = 20 * 1024 * 1024   # double-buffered data slabs per pass
_VMEM_LIMIT_BYTES = 40 * 1024 * 1024   # scoped VMEM limit (fits v7x 64 MiB physical)


def _accumulate_tile(x_ref, sum_ref, sq_ref, *, tile_l, total_l, needs_mask, lane_iota):
    """Lane-dense accumulation of one (c_i, tile_l) tile into (c_i, 128) partials."""
    n_full = tile_l // _LANES
    rem = tile_l - n_full * _LANES
    tile_base = pl.program_id(1) * tile_l

    s = None
    q = None
    for c in range(n_full):
        chunk = x_ref[:, c * _LANES:(c + 1) * _LANES].astype(jnp.float32)
        if needs_mask:
            ok = (tile_base + c * _LANES + lane_iota) < total_l
            chunk = jnp.where(ok, chunk, 0.0)
        if s is None:
            s = chunk
            q = chunk * chunk
        else:
            s = s + chunk
            q = q + chunk * chunk
    if s is not None:
        sum_ref[...] += s
        sq_ref[...] += q
    if rem:
        # Only reachable when tile_l == total_l (single lane tile), so no OOB mask needed.
        rc = x_ref[:, n_full * _LANES:tile_l].astype(jnp.float32)
        sum_ref[:, 0:rem] += rc
        sq_ref[:, 0:rem] += rc * rc


def _stats_kernel(*refs, n_inputs, tile_l, total_l, needs_mask):
    """refs = (x_0..x_{k-1}, sum_0..sum_{k-1}, sq_0..sq_{k-1}); accumulators resident over t."""
    x_refs = refs[:n_inputs]
    sum_refs = refs[n_inputs:2 * n_inputs]
    sq_refs = refs[2 * n_inputs:3 * n_inputs]

    @pl.when(pl.program_id(1) == 0)
    def _init():
        for r in sum_refs:
            r[...] = jnp.zeros_like(r)
        for r in sq_refs:
            r[...] = jnp.zeros_like(r)

    lane_iota = None
    if needs_mask:
        # Built once per invocation and reused across inputs / chunks.
        lane_iota = jax.lax.broadcasted_iota(jnp.int32, (1, _LANES), 1)

    for i in range(n_inputs):
        _accumulate_tile(x_refs[i], sum_refs[i], sq_refs[i],
                         tile_l=tile_l, total_l=total_l,
                         needs_mask=needs_mask, lane_iota=lane_iota)


def _norm_kernel(*refs, n_inputs, chan_offsets):
    """y = relu(x * scale + shift); each input's channels go to a static output offset."""
    scale_refs = refs[:n_inputs]
    shift_refs = refs[n_inputs:2 * n_inputs]
    x_refs = refs[2 * n_inputs:3 * n_inputs]
    o_ref = refs[3 * n_inputs]                              # (C_total, tile_l)
    for i in range(n_inputs):
        c_i = x_refs[i].shape[0]
        off = chan_offsets[i]
        x = x_refs[i][...].astype(jnp.float32)              # (C_i, tile_l)
        y = x * scale_refs[i][...] + shift_refs[i][...]
        o_ref[off:off + c_i, :] = jnp.maximum(y, 0.0).astype(o_ref.dtype)


def _choose_tile_l(total_l, bytes_per_lane_col, budget_bytes):
    tl = (budget_bytes // max(bytes_per_lane_col, 1)) // _LANES * _LANES
    tl = max(_LANES, tl)
    return total_l if total_l <= tl else tl


def cat_bn_act(xs, gamma, beta, *, eps=1e-3, tile_l_stats=None, tile_l_norm=None):
    """xs: tuple/list of NCHW arrays (or a single NCHW array). Returns NCHW output."""
    if not isinstance(xs, (tuple, list)):
        xs = (xs,)
    xs = tuple(xs)
    n_inputs = len(xs)
    N, _, H, W = xs[0].shape
    L = H * W
    chan_sizes = tuple(int(x.shape[1]) for x in xs)
    chan_offsets = []
    off = 0
    for c in chan_sizes:
        chan_offsets.append(off)
        off += c
    chan_offsets = tuple(chan_offsets)
    C = sum(chan_sizes)
    out_dtype = xs[0].dtype
    in_itemsize = jnp.dtype(xs[0].dtype).itemsize
    out_itemsize = jnp.dtype(out_dtype).itemsize

    # Free row-major reshape (no transpose, no concat): (N, C_i, H, W) -> (N, C_i, H*W)
    xs2 = tuple(x.reshape(x.shape[0], x.shape[1], L) for x in xs)

    # ---- per-pass lane-tile sizing ----
    # pass 1 VMEM per lane column: inputs only (double-buffered); pass 2 adds the output slab.
    acc_bytes = 2 * 2 * C * _LANES * 4
    tl1 = tile_l_stats if tile_l_stats else _choose_tile_l(
        L, 2 * C * in_itemsize, max(_VMEM_DATA_BUDGET - acc_bytes, 1 << 20))
    tl2 = tile_l_norm if tile_l_norm else _choose_tile_l(
        L, 2 * C * (in_itemsize + out_itemsize), _VMEM_DATA_BUDGET)
    if tl1 < L:
        assert tl1 % _LANES == 0, "stats lane tile must be a multiple of 128 when < L"

    n_t1 = pl.cdiv(L, tl1)
    needs_mask = (L % tl1) != 0

    x_specs1 = [pl.BlockSpec((pl.Squeezed(), c_i, tl1), lambda n, t: (n, 0, t))
                for c_i in chan_sizes]
    acc_specs = tuple(pl.BlockSpec((pl.Squeezed(), c_i, _LANES), lambda n, t: (n, 0, 0))
                      for c_i in chan_sizes)
    acc_shapes = tuple(jax.ShapeDtypeStruct((N, c_i, _LANES), jnp.float32)
                       for c_i in chan_sizes)

    # ---- pass 1: lane-dense per-channel partial sums / sums-of-squares ----
    stats = pl.pallas_call(
        functools.partial(_stats_kernel, n_inputs=n_inputs, tile_l=tl1,
                          total_l=L, needs_mask=needs_mask),
        out_shape=acc_shapes + acc_shapes,
        grid=(N, n_t1),
        in_specs=x_specs1,
        out_specs=acc_specs + acc_specs,
        compiler_params=pltpu.CompilerParams(
            dimension_semantics=("parallel", "arbitrary"),
            vmem_limit_bytes=_VMEM_LIMIT_BYTES),
    )(*xs2)
    sums = stats[:n_inputs]
    sqs = stats[n_inputs:]

    # Tiny JAX math: final (N,*,128) -> scalar-per-channel reduce, then fold
    # mean / biased-var / gamma / beta into per-channel scale & shift.
    count = jnp.float32(N * L)
    ssum = jnp.concatenate([s.sum(axis=(0, 2)) for s in sums])       # (C,)
    ssq = jnp.concatenate([q.sum(axis=(0, 2)) for q in sqs])         # (C,)
    mean = ssum / count
    var = jnp.maximum(ssq / count - mean * mean, 0.0)
    inv = jax.lax.rsqrt(var + jnp.float32(eps))
    scale = gamma.astype(jnp.float32) * inv
    shift = beta.astype(jnp.float32) - mean * scale
    scales = tuple(scale[o:o + c].reshape(c, 1)
                   for o, c in zip(chan_offsets, chan_sizes))
    shifts = tuple(shift[o:o + c].reshape(c, 1)
                   for o, c in zip(chan_offsets, chan_sizes))

    # ---- pass 2: y = relu(x*scale + shift); concat fused into the output stores ----
    n_t2 = pl.cdiv(L, tl2)
    x_specs2 = [pl.BlockSpec((pl.Squeezed(), c_i, tl2), lambda n, t: (n, 0, t))
                for c_i in chan_sizes]
    param_specs = [pl.BlockSpec((c_i, 1), lambda n, t: (0, 0)) for c_i in chan_sizes]

    out = pl.pallas_call(
        functools.partial(_norm_kernel, n_inputs=n_inputs, chan_offsets=chan_offsets),
        out_shape=jax.ShapeDtypeStruct((N, C, L), out_dtype),
        grid=(N, n_t2),
        in_specs=param_specs + param_specs + x_specs2,
        out_specs=pl.BlockSpec((pl.Squeezed(), C, tl2), lambda n, t: (n, 0, t)),
        compiler_params=pltpu.CompilerParams(
            dimension_semantics=("parallel", "parallel"),
            vmem_limit_bytes=_VMEM_LIMIT_BYTES),
    )(*scales, *shifts, *xs2)

    return out.reshape(N, C, H, W)


def _reference(xs, gamma, beta, eps=1e-3):
    x = jnp.concatenate(xs, axis=1) if isinstance(xs, (tuple, list)) else xs
    x32 = x.astype(jnp.float32)
    mean = jnp.mean(x32, axis=(0, 2, 3), keepdims=True)
    var = jnp.mean((x32 - mean) ** 2, axis=(0, 2, 3), keepdims=True)
    y = (x32 - mean) * jax.lax.rsqrt(var + eps)
    y = y * gamma.reshape(1, -1, 1, 1) + beta.reshape(1, -1, 1, 1)
    return jnp.maximum(y, 0.0).astype(x.dtype)


if __name__ == "__main__":
    key = jax.random.PRNGKey(0)
    k1, k2, k3, k4 = jax.random.split(key, 4)

    # Two NCHW feature maps concatenated along channels (in_chs = 4 + 4 = 8).
    x_a = jax.random.normal(k1, (2, 4, 16, 16), dtype=jnp.float32)
    x_b = jax.random.normal(k2, (2, 4, 16, 16), dtype=jnp.float32)
    in_chs = 8
    gamma = 1.0 + 0.1 * jax.random.normal(k3, (in_chs,), dtype=jnp.float32)
    beta = 0.1 * jax.random.normal(k4, (in_chs,), dtype=jnp.float32)

    fn = jax.jit(lambda xa, xb, g, b: cat_bn_act((xa, xb), g, b, eps=1e-3))
    out = jax.block_until_ready(fn(x_a, x_b, gamma, beta))
    ref = _reference((x_a, x_b), gamma, beta, eps=1e-3)
    assert out.shape == (2, 8, 16, 16)
    assert float(jnp.max(jnp.abs(out - ref))) < 1e-4

    # Second check: force multiple lane tiles with a partial tail tile so the masked
    # stats path and the OOB-dropped output lanes are exercised (L = 16*18 = 288).
    k5, k6 = jax.random.split(k1)
    y_a = jax.random.normal(k5, (2, 4, 16, 18), dtype=jnp.float32)
    y_b = jax.random.normal(k6, (2, 4, 16, 18), dtype=jnp.float32)
    fn2 = jax.jit(lambda xa, xb, g, b: cat_bn_act(
        (xa, xb), g, b, eps=1e-3, tile_l_stats=128, tile_l_norm=128))
    out2 = jax.block_until_ready(fn2(y_a, y_b, gamma, beta))
    ref2 = _reference((y_a, y_b), gamma, beta, eps=1e-3)
    assert out2.shape == (2, 8, 16, 18)
    assert float(jnp.max(jnp.abs(out2 - ref2))) < 1e-4

    print("KERNEL_OK")
</pallas_src>

<mosaic_0001>
module attributes {stable_mosaic.version = 11 : i64} {
  func.func @_stats_kernel(%arg0: i32, %arg1: i32, %arg2: memref<1x4x256xf32, #tpu.memory_space<vmem>>, %arg3: memref<1x4x256xf32, #tpu.memory_space<vmem>>, %arg4: memref<1x4x128xf32, #tpu.memory_space<vmem>>, %arg5: memref<1x4x128xf32, #tpu.memory_space<vmem>>, %arg6: memref<1x4x128xf32, #tpu.memory_space<vmem>>, %arg7: memref<1x4x128xf32, #tpu.memory_space<vmem>>) attributes {dimension_semantics = [#tpu.dimension_semantics<parallel>, #tpu.dimension_semantics<arbitrary>], iteration_bounds = array<i64: 2, 1>, scalar_prefetch = 0 : i64, scratch_operands = 0 : i64, tpu.core_type = #tpu.core_type<tc>, window_params = [{transform_indices = @transform_0, window_bounds = array<i64: 1, 4, 256>}, {transform_indices = @transform_1, window_bounds = array<i64: 1, 4, 256>}, {transform_indices = @transform_2, window_bounds = array<i64: 1, 4, 128>}, {transform_indices = @transform_3, window_bounds = array<i64: 1, 4, 128>}, {transform_indices = @transform_4, window_bounds = array<i64: 1, 4, 128>}, {transform_indices = @transform_5, window_bounds = array<i64: 1, 4, 128>}]} {
    %c0_i32 = arith.constant 0 : i32
    %0 = arith.cmpi eq, %arg1, %c0_i32 : i32
    %1 = arith.extui %0 : i1 to i32
    %c0_i32_0 = arith.constant 0 : i32
    %2 = arith.cmpi ne, %1, %c0_i32_0 : i32
    scf.if %2 {
      %cst = arith.constant 0.000000e+00 : f32
      %43 = vector.broadcast %cst : f32 to vector<4x128xf32>
      %c0_35 = arith.constant 0 : index
      %c0_36 = arith.constant 0 : index
      %c0_37 = arith.constant 0 : index
      %44 = vector.load %arg4[%c0_35, %c0_36, %c0_37] : memref<1x4x128xf32, #tpu.memory_space<vmem>>, vector<1x4x128xf32>
      %45 = vector.shape_cast %44 : vector<1x4x128xf32> to vector<4x128xf32>
      %46 = vector.shape_cast %43 : vector<4x128xf32> to vector<1x4x128xf32>
      tpu.vector_store %arg4[%c0_35, %c0_36, %c0_37], %46 {strides = array<i32>} : memref<1x4x128xf32, #tpu.memory_space<vmem>>, vector<1x4x128xf32>,
      %cst_38 = arith.constant 0.000000e+00 : f32
      %47 = vector.broadcast %cst_38 : f32 to vector<4x128xf32>
      %c0_39 = arith.constant 0 : index
      %c0_40 = arith.constant 0 : index
      %c0_41 = arith.constant 0 : index
      %48 = vector.load %arg5[%c0_39, %c0_40, %c0_41] : memref<1x4x128xf32, #tpu.memory_space<vmem>>, vector<1x4x128xf32>
      %49 = vector.shape_cast %48 : vector<1x4x128xf32> to vector<4x128xf32>
      %50 = vector.shape_cast %47 : vector<4x128xf32> to vector<1x4x128xf32>
      tpu.vector_store %arg5[%c0_39, %c0_40, %c0_41], %50 {strides = array<i32>} : memref<1x4x128xf32, #tpu.memory_space<vmem>>, vector<1x4x128xf32>,
      %cst_42 = arith.constant 0.000000e+00 : f32
      %51 = vector.broadcast %cst_42 : f32 to vector<4x128xf32>
      %c0_43 = arith.constant 0 : index
      %c0_44 = arith.constant 0 : index
      %c0_45 = arith.constant 0 : index
      %52 = vector.load %arg6[%c0_43, %c0_44, %c0_45] : memref<1x4x128xf32, #tpu.memory_space<vmem>>, vector<1x4x128xf32>
      %53 = vector.shape_cast %52 : vector<1x4x128xf32> to vector<4x128xf32>
      %54 = vector.shape_cast %51 : vector<4x128xf32> to vector<1x4x128xf32>
      tpu.vector_store %arg6[%c0_43, %c0_44, %c0_45], %54 {strides = array<i32>} : memref<1x4x128xf32, #tpu.memory_space<vmem>>, vector<1x4x128xf32>,
      %cst_46 = arith.constant 0.000000e+00 : f32
      %55 = vector.broadcast %cst_46 : f32 to vector<4x128xf32>
      %c0_47 = arith.constant 0 : index
      %c0_48 = arith.constant 0 : index
      %c0_49 = arith.constant 0 : index
      %56 = vector.load %arg7[%c0_47, %c0_48, %c0_49] : memref<1x4x128xf32, #tpu.memory_space<vmem>>, vector<1x4x128xf32>
      %57 = vector.shape_cast %56 : vector<1x4x128xf32> to vector<4x128xf32>
      %58 = vector.shape_cast %55 : vector<4x128xf32> to vector<1x4x128xf32>
      tpu.vector_store %arg7[%c0_47, %c0_48, %c0_49], %58 {strides = array<i32>} : memref<1x4x128xf32, #tpu.memory_space<vmem>>, vector<1x4x128xf32>,
    } else {
    }
    %c0 = arith.constant 0 : index
    %c0_1 = arith.constant 0 : index
    %c0_2 = arith.constant 0 : index
    %3 = vector.load %arg2[%c0, %c0_1, %c0_2] : memref<1x4x256xf32, #tpu.memory_space<vmem>>, vector<1x4x128xf32>
    %4 = vector.shape_cast %3 : vector<1x4x128xf32> to vector<4x128xf32>
    %5 = arith.mulf %4, %4 : vector<4x128xf32>
    %c0_3 = arith.constant 0 : index
    %c0_4 = arith.constant 0 : index
    %c128 = arith.constant 128 : index
    %6 = vector.load %arg2[%c0_3, %c0_4, %c128] : memref<1x4x256xf32, #tpu.memory_space<vmem>>, vector<1x4x128xf32>
    %7 = vector.shape_cast %6 : vector<1x4x128xf32> to vector<4x128xf32>
    %8 = arith.addf %4, %7 : vector<4x128xf32>
    %9 = arith.mulf %7, %7 : vector<4x128xf32>
    %10 = arith.addf %5, %9 : vector<4x128xf32>
    %c0_5 = arith.constant 0 : index
    %c0_6 = arith.constant 0 : index
    %c0_7 = arith.constant 0 : index
    %11 = vector.load %arg4[%c0_5, %c0_6, %c0_7] : memref<1x4x128xf32, #tpu.memory_space<vmem>>, vector<1x4x128xf32>
    %12 = vector.shape_cast %11 : vector<1x4x128xf32> to vector<4x128xf32>
    %13 = arith.addf %12, %8 : vector<4x128xf32>
    %c0_8 = arith.constant 0 : index
    %c0_9 = arith.constant 0 : index
    %c0_10 = arith.constant 0 : index
    %14 = vector.load %arg4[%c0_8, %c0_9, %c0_10] : memref<1x4x128xf32, #tpu.memory_space<vmem>>, vector<1x4x128xf32>
    %15 = vector.shape_cast %14 : vector<1x4x128xf32> to vector<4x128xf32>
    %16 = vector.shape_cast %13 : vector<4x128xf32> to vector<1x4x128xf32>
    tpu.vector_store %arg4[%c0_8, %c0_9, %c0_10], %16 {strides = array<i32>} : memref<1x4x128xf32, #tpu.memory_space<vmem>>, vector<1x4x128xf32>,
    %c0_11 = arith.constant 0 : index
    %c0_12 = arith.constant 0 : index
    %c0_13 = arith.constant 0 : index
    %17 = vector.load %arg6[%c0_11, %c0_12, %c0_13] : memref<1x4x128xf32, #tpu.memory_space<vmem>>, vector<1x4x128xf32>
    %18 = vector.shape_cast %17 : vector<1x4x128xf32> to vector<4x128xf32>
    %19 = arith.addf %18, %10 : vector<4x128xf32>
    %c0_14 = arith.constant 0 : index
    %c0_15 = arith.constant 0 : index
    %c0_16 = arith.constant 0 : index
    %20 = vector.load %arg6[%c0_14, %c0_15, %c0_16] : memref<1x4x128xf32, #tpu.memory_space<vmem>>, vector<1x4x128xf32>
    %21 = vector.shape_cast %20 : vector<1x4x128xf32> to vector<4x128xf32>
    %22 = vector.shape_cast %19 : vector<4x128xf32> to vector<1x4x128xf32>
    tpu.vector_store %arg6[%c0_14, %c0_15, %c0_16], %22 {strides = array<i32>} : memref<1x4x128xf32, #tpu.memory_space<vmem>>, vector<1x4x128xf32>,
    %c0_17 = arith.constant 0 : index
    %c0_18 = arith.constant 0 : index
    %c0_19 = arith.constant 0 : index
    %23 = vector.load %arg3[%c0_17, %c0_18, %c0_19] : memref<1x4x256xf32, #tpu.memory_space<vmem>>, vector<1x4x128xf32>
    %24 = vector.shape_cast %23 : vector<1x4x128xf32> to vector<4x128xf32>
    %25 = arith.mulf %24, %24 : vector<4x128xf32>
    %c0_20 = arith.constant 0 : index
    %c0_21 = arith.constant 0 : index
    %c128_22 = arith.constant 128 : index
    %26 = vector.load %arg3[%c0_20, %c0_21, %c128_22] : memref<1x4x256xf32, #tpu.memory_space<vmem>>, vector<1x4x128xf32>
    %27 = vector.shape_cast %26 : vector<1x4x128xf32> to vector<4x128xf32>
    %28 = arith.addf %24, %27 : vector<4x128xf32>
    %29 = arith.mulf %27, %27 : vector<4x128xf32>
    %30 = arith.addf %25, %29 : vector<4x128xf32>
    %c0_23 = arith.constant 0 : index
    %c0_24 = arith.constant 0 : index
    %c0_25 = arith.constant 0 : index
    %31 = vector.load %arg5[%c0_23, %c0_24, %c0_25] : memref<1x4x128xf32, #tpu.memory_space<vmem>>, vector<1x4x128xf32>
    %32 = vector.shape_cast %31 : vector<1x4x128xf32> to vector<4x128xf32>
    %33 = arith.addf %32, %28 : vector<4x128xf32>
    %c0_26 = arith.constant 0 : index
    %c0_27 = arith.constant 0 : index
    %c0_28 = arith.constant 0 : index
    %34 = vector.load %arg5[%c0_26, %c0_27, %c0_28] : memref<1x4x128xf32, #tpu.memory_space<vmem>>, vector<1x4x128xf32>
    %35 = vector.shape_cast %34 : vector<1x4x128xf32> to vector<4x128xf32>
    %36 = vector.shape_cast %33 : vector<4x128xf32> to vector<1x4x128xf32>
    tpu.vector_store %arg5[%c0_26, %c0_27, %c0_28], %36 {strides = array<i32>} : memref<1x4x128xf32, #tpu.memory_space<vmem>>, vector<1x4x128xf32>,
    %c0_29 = arith.constant 0 : index
    %c0_30 = arith.constant 0 : index
    %c0_31 = arith.constant 0 : index
    %37 = vector.load %arg7[%c0_29, %c0_30, %c0_31] : memref<1x4x128xf32, #tpu.memory_space<vmem>>, vector<1x4x128xf32>
    %38 = vector.shape_cast %37 : vector<1x4x128xf32> to vector<4x128xf32>
    %39 = arith.addf %38, %30 : vector<4x128xf32>
    %c0_32 = arith.constant 0 : index
    %c0_33 = arith.constant 0 : index
    %c0_34 = arith.constant 0 : index
    %40 = vector.load %arg7[%c0_32, %c0_33, %c0_34] : memref<1x4x128xf32, #tpu.memory_space<vmem>>, vector<1x4x128xf32>
    %41 = vector.shape_cast %40 : vector<1x4x128xf32> to vector<4x128xf32>
    %42 = vector.shape_cast %39 : vector<4x128xf32> to vector<1x4x128xf32>
    tpu.vector_store %arg7[%c0_32, %c0_33, %c0_34], %42 {strides = array<i32>} : memref<1x4x128xf32, #tpu.memory_space<vmem>>, vector<1x4x128xf32>,
    return
  }
  func.func @transform_0(%arg0: i32, %arg1: i32) -> (i32, i32, i32) {
    %c0_i32 = arith.constant 0 : i32
    %c0_i32_0 = arith.constant 0 : i32
    return %arg0, %c0_i32, %arg1 : i32, i32, i32
  }
  func.func @transform_1(%arg0: i32, %arg1: i32) -> (i32, i32, i32) {
    %c0_i32 = arith.constant 0 : i32
    %c0_i32_0 = arith.constant 0 : i32
    return %arg0, %c0_i32, %arg1 : i32, i32, i32
  }
  func.func @transform_2(%arg0: i32, %arg1: i32) -> (i32, i32, i32) {
    %c0_i32 = arith.constant 0 : i32
    %c0_i32_0 = arith.constant 0 : i32
    %c0_i32_1 = arith.constant 0 : i32
    return %arg0, %c0_i32, %c0_i32_0 : i32, i32, i32
  }
  func.func @transform_3(%arg0: i32, %arg1: i32) -> (i32, i32, i32) {
    %c0_i32 = arith.constant 0 : i32
    %c0_i32_0 = arith.constant 0 : i32
    %c0_i32_1 = arith.constant 0 : i32
    return %arg0, %c0_i32, %c0_i32_0 : i32, i32, i32
  }
  func.func @transform_4(%arg0: i32, %arg1: i32) -> (i32, i32, i32) {
    %c0_i32 = arith.constant 0 : i32
    %c0_i32_0 = arith.constant 0 : i32
    %c0_i32_1 = arith.constant 0 : i32
    return %arg0, %c0_i32, %c0_i32_0 : i32, i32, i32
  }
  func.func @transform_5(%arg0: i32, %arg1: i32) -> (i32, i32, i32) {
    %c0_i32 = arith.constant 0 : i32
    %c0_i32_0 = arith.constant 0 : i32
    %c0_i32_1 = arith.constant 0 : i32
    return %arg0, %c0_i32, %c0_i32_0 : i32, i32, i32
  }
}

module attributes {stable_mosaic.version = 11 : i64} {
  func.func @_norm_kernel(%arg0: i32, %arg1: i32, %arg2: memref<4x1xf32, #tpu.memory_space<vmem>>, %arg3: memref<4x1xf32, #tpu.memory_space<vmem>>, %arg4: memref<4x1xf32, #tpu.memory_space<vmem>>, %arg5: memref<4x1xf32, #tpu.memory_space<vmem>>, %arg6: memref<1x4x256xf32, #tpu.memory_space<vmem>>, %arg7: memref<1x4x256xf32, #tpu.memory_space<vmem>>, %arg8: memref<1x8x256xf32, #tpu.memory_space<vmem>>) attributes {dimension_semantics = [#tpu.dimension_semantics<parallel>, #tpu.dimension_semantics<parallel>], iteration_bounds = array<i64: 2, 1>, scalar_prefetch = 0 : i64, scratch_operands = 0 : i64, tpu.core_type = #tpu.core_type<tc>, window_params = [{pipeline_mode = #tpu.pipeline_mode<synchronous>, transform_indices = @transform_0, window_bounds = array<i64: 4, 1>}, {pipeline_mode = #tpu.pipeline_mode<synchronous>, transform_indices = @transform_1, window_bounds = array<i64: 4, 1>}, {pipeline_mode = #tpu.pipeline_mode<synchronous>, transform_indices = @transform_2, window_bounds = array<i64: 4, 1>}, {pipeline_mode = #tpu.pipeline_mode<synchronous>, transform_indices = @transform_3, window_bounds = array<i64: 4, 1>}, {transform_indices = @transform_4, window_bounds = array<i64: 1, 4, 256>}, {transform_indices = @transform_5, window_bounds = array<i64: 1, 4, 256>}, {transform_indices = @transform_6, window_bounds = array<i64: 1, 8, 256>}]} {
    %c0 = arith.constant 0 : index
    %c0_0 = arith.constant 0 : index
    %c0_1 = arith.constant 0 : index
    %0 = vector.load %arg6[%c0, %c0_0, %c0_1] : memref<1x4x256xf32, #tpu.memory_space<vmem>>, vector<1x4x256xf32>
    %1 = vector.shape_cast %0 : vector<1x4x256xf32> to vector<4x256xf32>
    %c0_2 = arith.constant 0 : index
    %c0_3 = arith.constant 0 : index
    %2 = vector.load %arg2[%c0_2, %c0_3] : memref<4x1xf32, #tpu.memory_space<vmem>>, vector<4x1xf32>
    %3 = vector.broadcast %2 : vector<4x1xf32> to vector<4x256xf32>
    %4 = arith.mulf %1, %3 : vector<4x256xf32>
    %c0_4 = arith.constant 0 : index
    %c0_5 = arith.constant 0 : index
    %5 = vector.load %arg4[%c0_4, %c0_5] : memref<4x1xf32, #tpu.memory_space<vmem>>, vector<4x1xf32>
    %6 = vector.broadcast %5 : vector<4x1xf32> to vector<4x256xf32>
    %7 = arith.addf %4, %6 : vector<4x256xf32>
    %cst = arith.constant 0.000000e+00 : f32
    %8 = vector.broadcast %cst : f32 to vector<4x256xf32>
    %9 = arith.maximumf %7, %8 : vector<4x256xf32>
    %c0_6 = arith.constant 0 : index
    %c0_7 = arith.constant 0 : index
    %c0_8 = arith.constant 0 : index
    %10 = vector.load %arg8[%c0_6, %c0_7, %c0_8] : memref<1x8x256xf32, #tpu.memory_space<vmem>>, vector<1x4x256xf32>
    %11 = vector.shape_cast %10 : vector<1x4x256xf32> to vector<4x256xf32>
    %12 = vector.shape_cast %9 : vector<4x256xf32> to vector<1x4x256xf32>
    tpu.vector_store %arg8[%c0_6, %c0_7, %c0_8], %12 {strides = array<i32>} : memref<1x8x256xf32, #tpu.memory_space<vmem>>, vector<1x4x256xf32>,
    %c0_9 = arith.constant 0 : index
    %c0_10 = arith.constant 0 : index
    %c0_11 = arith.constant 0 : index
    %13 = vector.load %arg7[%c0_9, %c0_10, %c0_11] : memref<1x4x256xf32, #tpu.memory_space<vmem>>, vector<1x4x256xf32>
    %14 = vector.shape_cast %13 : vector<1x4x256xf32> to vector<4x256xf32>
    %c0_12 = arith.constant 0 : index
    %c0_13 = arith.constant 0 : index
    %15 = vector.load %arg3[%c0_12, %c0_13] : memref<4x1xf32, #tpu.memory_space<vmem>>, vector<4x1xf32>
    %16 = vector.broadcast %15 : vector<4x1xf32> to vector<4x256xf32>
    %17 = arith.mulf %14, %16 : vector<4x256xf32>
    %c0_14 = arith.constant 0 : index
    %c0_15 = arith.constant 0 : index
    %18 = vector.load %arg5[%c0_14, %c0_15] : memref<4x1xf32, #tpu.memory_space<vmem>>, vector<4x1xf32>
    %19 = vector.broadcast %18 : vector<4x1xf32> to vector<4x256xf32>
    %20 = arith.addf %17, %19 : vector<4x256xf32>
    %cst_16 = arith.constant 0.000000e+00 : f32
    %21 = vector.broadcast %cst_16 : f32 to vector<4x256xf32>
    %22 = arith.maximumf %20, %21 : vector<4x256xf32>
    %c0_17 = arith.constant 0 : index
    %c4 = arith.constant 4 : index
    %c0_18 = arith.constant 0 : index
    %23 = vector.load %arg8[%c0_17, %c4, %c0_18] : memref<1x8x256xf32, #tpu.memory_space<vmem>>, vector<1x4x256xf32>
    %24 = vector.shape_cast %23 : vector<1x4x256xf32> to vector<4x256xf32>
    %25 = vector.shape_cast %22 : vector<4x256xf32> to vector<1x4x256xf32>
    tpu.vector_store %arg8[%c0_17, %c4, %c0_18], %25 {strides = array<i32>} : memref<1x8x256xf32, #tpu.memory_space<vmem>>, vector<1x4x256xf32>,
    return
  }
  func.func @transform_0(%arg0: i32, %arg1: i32) -> (i32, i32) {
    %c0_i32 = arith.constant 0 : i32
    %c0_i32_0 = arith.constant 0 : i32
    %c0_i32_1 = arith.constant 0 : i32
    return %c0_i32, %c0_i32_0 : i32, i32
  }
  func.func @transform_1(%arg0: i32, %arg1: i32) -> (i32, i32) {
    %c0_i32 = arith.constant 0 : i32
    %c0_i32_0 = arith.constant 0 : i32
    %c0_i32_1 = arith.constant 0 : i32
    return %c0_i32, %c0_i32_0 : i32, i32
  }
  func.func @transform_2(%arg0: i32, %arg1: i32) -> (i32, i32) {
    %c0_i32 = arith.constant 0 : i32
    %c0_i32_0 = arith.constant 0 : i32
    %c0_i32_1 = arith.constant 0 : i32
    return %c0_i32, %c0_i32_0 : i32, i32
  }
  func.func @transform_3(%arg0: i32, %arg1: i32) -> (i32, i32) {
    %c0_i32 = arith.constant 0 : i32
    %c0_i32_0 = arith.constant 0 : i32
    %c0_i32_1 = arith.constant 0 : i32
    return %c0_i32, %c0_i32_0 : i32, i32
  }
  func.func @transform_4(%arg0: i32, %arg1: i32) -> (i32, i32, i32) {
    %c0_i32 = arith.constant 0 : i32
    %c0_i32_0 = arith.constant 0 : i32
    return %arg0, %c0_i32, %arg1 : i32, i32, i32
  }
  func.func @transform_5(%arg0: i32, %arg1: i32) -> (i32, i32, i32) {
    %c0_i32 = arith.constant 0 : i32
    %c0_i32_0 = arith.constant 0 : i32
    return %arg0, %c0_i32, %arg1 : i32, i32, i32
  }
  func.func @transform_6(%arg0: i32, %arg1: i32) -> (i32, i32, i32) {
    %c0_i32 = arith.constant 0 : i32
    %c0_i32_0 = arith.constant 0 : i32
    return %arg0, %c0_i32, %arg1 : i32, i32, i32
  }
}

</mosaic_0001>

<bundles_post_ra>
// kernel: _lambda_.2
= control target key start
LH: loop header
LB: loop body
LE: loop exit
PB: predicated region body
PF: predicated region fallthrough
CT: control target
= control target key end

     0   :  { %s625_s18 = smov 0   ;;  %s627_s19 = smov 0   ;;  %s680_s0 = inlined_call_operand.vmem [shape: f32[2,4,256], index: 0, kind: input, shape index: {}]   ;;  %s681_s1 = inlined_call_operand.vmem [shape: f32[2,4,256], index: 1, kind: input, shape index: {}]   ;;  %s682_s2 = inlined_call_operand.vmem [shape: f32[2,4,128], index: 2, kind: output, shape index: {0}]   ;;  %s683_s3 = inlined_call_operand.vmem [shape: f32[2,4,128], index: 3, kind: output, shape index: {1}]   ;;  %s684_s4 = inlined_call_operand.vmem [shape: f32[2,4,128], index: 4, kind: output, shape index: {2}]   ;;  %s685_s5 = inlined_call_operand.vmem [shape: f32[2,4,128], index: 5, kind: output, shape index: {3}]  }
   0x1   :  { %s629_s20 = smov 0  }
   0x2 LB: > { %s28_s21 = sadd.s32 1, %s588_s19  ;;  %p532_p0 = scmp.ge.s32.totalorder %s592_s20, 1  ;;  %s592_s20 = sphi %s629_s20, %s16_s20   ;;  %s588_s19 = sphi %s627_s19, %s687_s19   ;;  %s584_s18 = sphi %s625_s18, %s686_s18  }
   0x3   : > { %p30_p1 = scmp.ge.s32.totalorder %s28_s21, 2  ;;  %p230_p2 = scmp.lt.s32.totalorder %s592_s20, 3 }
   0x5   : > { %s689_s21 = smov (%p30_p1, %s28_s21), 0  ;;  %p231_p3 = pnand %p532_p0, %p230_p2 }
   0x6   : > { %p283_p4 = scmp.lt.s32.totalorder (!%p231_p3), %s584_s18, 1 }
   0x7   : > { %234 = sbr.rel (%p231_p3) target bundleno = 29 (0x1d), region = 28 }
   0xc   : > { %s691_s18 = smov (!%p283_p4, %s584_s18), 1  ;;  %v594_v0 = vmov 0.0  }
   0xd   : > { %s537_s22 = sshll.u32 %s691_s18, 2  ;;  %s543_s23 = sshll.u32 %s691_s18, 3 }
   0xe   : > { %s646_s26 = scalar_lea.vmem %s682_s2, %s537_s22  ;;  %s651_s29 = scalar_lea.vmem %s683_s3, %s537_s22 }
   0xf   : > { %322 = vst [vmem:[%s646_s26] sm:$0xf] %v594_v0  ;;  %323 = vst [vmem:[%s651_s29] sm:$0xf] %v594_v0  ;;  %s313_s7 = scalar_lea.vmem %s684_s4, %s537_s22  ;;  %s317_s10 = scalar_lea.vmem %s685_s5, %s537_s22 }
  0x10   : > { %324 = vst [vmem:[%s313_s7] sm:$0xf] %v594_v0  ;;  %325 = vst [vmem:[%s317_s10] sm:$0xf] %v594_v0  ;;  %s290_s13 = scalar_lea.vmem %s680_s0, %s543_s23  ;;  %s300_s16 = scalar_lea.vmem %s681_s1, %s543_s23 }
  0x11   : > { %v326_v1 = vld [vmem:[%s290_s13] sm:$0xf]  ;;  %v328_v2 = vld [vmem:[%s290_s13 + $0x4] sm:$0xf] }
  0x12   : > { %v338_v3 = vld [vmem:[%s300_s16] sm:$0xf]  ;;  %v327_v4 = vmul.f32 %v326_v1, %v326_v1  ;;  %v330_v5 = vmul.f32 %v328_v2, %v328_v2  ;;  %v340_v6 = vld [vmem:[%s300_s16 + $0x4] sm:$0xf]  ;;  %v329_v8 = vadd.f32 %v328_v2, %v326_v1 }
  0x13   : > { %v339_v7 = vmul.f32 %v338_v3, %v338_v3  ;;  %v341_v9 = vadd.f32 %v340_v6, %v338_v3  ;;  %v342_v10 = vmul.f32 %v340_v6, %v340_v6 }
  0x14   : > { %v331_v11 = vadd.f32 %v330_v5, %v327_v4 }
  0x15   : > { %v343_v12 = vadd.f32 %v342_v10, %v339_v7 }
  0x16   : > { %v332_v13 = vld [vmem:[%s646_s26] sm:$0xf] }
  0x17   : > { %v344_v14 = vld [vmem:[%s651_s29] sm:$0xf]  ;;  %v333_v15 = vadd.f32 %v332_v13, %v329_v8 }
  0x18   : > { %v335_v16 = vld [vmem:[%s313_s7] sm:$0xf]  ;;  %v345_v17 = vadd.f32 %v344_v14, %v341_v9 }
  0x19   : > { %v347_v18 = vld [vmem:[%s317_s10] sm:$0xf]  ;;  %v336_v19 = vadd.f32 %v335_v16, %v331_v11  ;;  %334 = vst [vmem:[%s646_s26] sm:$0xf] %v333_v15 }
  0x1a   : > { %v348_v20 = vadd.f32 %v347_v18, %v343_v12  ;;  %346 = vst [vmem:[%s651_s29] sm:$0xf] %v345_v17 }
  0x1b   : > { %337 = vst [vmem:[%s313_s7] sm:$0xf] %v336_v19 }
  0x1c   : > { %349 = vst [vmem:[%s317_s10] sm:$0xf] %v348_v20 }
  0x1d PF: > { %s16_s20 = sadd.s32 1, %s592_s20   ;;  %s686_s18 = smov %s588_s19 }
  0x1e   : > { %p13_p5 = scmp.ge.s32.totalorder %s16_s20, 4   ;;  %s687_s19 = smov %s689_s21 }
  0x20   :  { %15 = sbr.rel (!%p13_p5) target bundleno = 2 (0x2), region = 101 }

// kernel: _lambda_.3
= control target key start
LH: loop header
LB: loop body
LE: loop exit
PB: predicated region body
PF: predicated region fallthrough
CT: control target
= control target key end

     0   :  { %s607_s21 = smov 0   ;;  %s609_s22 = smov 0   ;;  %s655_s0 = inlined_call_operand.vmem [shape: f32[4,1], index: 0, kind: input, shape index: {}]   ;;  %s656_s1 = inlined_call_operand.vmem [shape: f32[4,1], index: 1, kind: input, shape index: {}]   ;;  %s657_s2 = inlined_call_operand.vmem [shape: f32[4,1], index: 2, kind: input, shape index: {}]   ;;  %s658_s3 = inlined_call_operand.vmem [shape: f32[4,1], index: 3, kind: input, shape index: {}]   ;;  %s659_s4 = inlined_call_operand.vmem [shape: f32[2,4,256], index: 4, kind: input, shape index: {}]   ;;  %s660_s5 = inlined_call_operand.vmem [shape: f32[2,4,256], index: 5, kind: input, shape index: {}]   ;;  %s661_s6 = inlined_call_operand.vmem [shape: f32[2,8,256], index: 6, kind: output, shape index: {}]  }
   0x1   :  { %s611_s23 = smov 0  }
   0x2 LB: > { %s28_s24 = sadd.s32 1, %s564_s22  ;;  %p506_p0 = scmp.ge.s32.totalorder %s568_s23, 1  ;;  %s568_s23 = sphi %s611_s23, %s16_s23   ;;  %s564_s22 = sphi %s609_s22, %s663_s22   ;;  %s560_s21 = sphi %s607_s21, %s662_s21  }
   0x3   : > { %p30_p1 = scmp.ge.s32.totalorder %s28_s24, 2  ;;  %p250_p2 = scmp.lt.s32.totalorder %s568_s23, 3 }
   0x5   : > { %s665_s24 = smov (%p30_p1, %s28_s24), 0  ;;  %p251_p3 = pnand %p506_p0, %p250_p2 }
   0x6   : > { %p298_p4 = scmp.lt.s32.totalorder (!%p251_p3), %s560_s21, 1 }
   0x7   : > { %254 = sbr.rel (%p251_p3) target bundleno = 153 (0x99), region = 44 }
   0xc   : > { %v342_v0 = vld [vmem:[%s657_s2] sm:$0xf]  ;;  %v570_v2 = vmov 0   ;;  %v571_v5 = vmov 839922192   ;;  %v336_v7 = vlaneseq  ;;  %s667_s21 = smov (!%p298_p4, %s560_s21), 1 }
   0xd   : > { %v328_v1 = vld [vmem:[%s655_s0] sm:$0xf]  ;;  %545 = vset.pattern.permute.xlu1 %v570_v2  ;;  %544 = vset.pattern.permute.xlu0 %v570_v2  ;;  %v334_v6 = vunpack.c.l.s4 %v571_v5  ;;  %s515_s9 = sshll.u32 %s667_s21, 3  ;;  %s517_s16 = sshll.u32 %s667_s21, 4 }
   0xe   : > { %345 = vperm.xlu1 %545, %v342_v0   ;;  %331 = vperm.xlu0 %544, %v328_v1   ;;  %v377_v3 = vld [vmem:[%s658_s3] sm:$0xf]  ;;  %v337_v9 = vshrl.u32 %v336_v7, 7  ;;  %s305_s12 = scalar_lea.vmem %s659_s4, %s515_s9  ;;  %s315_s15 = scalar_lea.vmem %s660_s5, %s515_s9 }
   0xf   : > { %v363_v4 = vld [vmem:[%s656_s1] sm:$0xf]  ;;  %v335_v8 = vunpack.c.0.s8 %v334_v6  ;;  %s325_s19 = scalar_lea.vmem %s661_s6, %s517_s16 }
  0x10   : > { %v327_v13 = vld [vmem:[%s305_s12] sm:$0xff] }
  0x11   : > { %v338_v10 = vsub.s32 %v335_v8, %v337_v9  ;;  %v362_v19 = vld [vmem:[%s315_s15] sm:$0xff] }
  0x12   : > { %380 = vperm.xlu1 %545, %v377_v3   ;;  %366 = vperm.xlu0 %544, %v363_v4  }
  0x89   : > { %v346_v11 = vpop.permute.xlu1 %345  ;;  %v332_v12 = vpop.permute.xlu0 %331 }
  0x8a   : > { %v353_v14 = vrot.slane %v346_v11, %v338_v10  ;;  %v339_v15 = vrot.slane %v332_v12, %v338_v10 }
  0x8c   : > { %v341_v16 = vmul.f32 %v339_v15, %v327_v13 }
  0x8d   : > { %v381_v17 = vpop.permute.xlu1 %380  ;;  %v367_v18 = vpop.permute.xlu0 %366 }
  0x8e   : > { %v355_v20 = vadd.f32 %v353_v14, %v341_v16  ;;  %v374_v21 = vrot.slane %v367_v18, %v338_v10  ;;  %v388_v23 = vrot.slane %v381_v17, %v338_v10 }
  0x90   : > { %v356_v22 = vmax.f32 %v355_v20, 0.0  ;;  %v376_v24 = vmul.f32 %v374_v21, %v362_v19 }
  0x92   : > { %v358_v25 = vcombine.high %v356_v22, %v356_v22  ;;  %360 = vst [vmem:[%s325_s19] sm:$0xf] %v356_v22  ;;  %v390_v26 = vadd.f32 %v388_v23, %v376_v24 }
  0x94   : > { %361 = vst [vmem:[%s325_s19 + $0x8] sm:$0xf] %v358_v25  ;;  %v391_v27 = vmax.f32 %v390_v26, 0.0 }
  0x96   : > { %v393_v28 = vcombine.low %v391_v27, %v391_v27  ;;  %396 = vst [vmem:[%s325_s19 + $0x8] sm:$0xf0] %v391_v27 }
  0x98   : > { %395 = vst [vmem:[%s325_s19] sm:$0xf0] %v393_v28 }
  0x99 PF: > { %s16_s23 = sadd.s32 1, %s568_s23   ;;  %s662_s21 = smov %s564_s22 }
  0x9a   : > { %p13_p5 = scmp.ge.s32.totalorder %s16_s23, 4   ;;  %s663_s22 = smov %s665_s24 }
  0x9c   :  { %15 = sbr.rel (!%p13_p5) target bundleno = 2 (0x2), region = 77 }

</bundles_post_ra>
